<compile_context>
chip_gen: v5e
topology: v5e:2x2
jax: 0.10.0
libtpu: 0.0.40
codegen_flags: <defaults>
</compile_context>

<pallas_src>
import jax
import jax.numpy as jnp
from jax.experimental import pallas as pl
from jax.experimental.pallas import tpu as pltpu


def _spatial_attn_kernel(w_ref, b_ref, x_ref, o_ref):
    # w_ref : SMEM (C,)  f32   -- 1x1-conv weight
    # b_ref : SMEM (1,)  f32   -- conv bias
    # x_ref : VMEM (C, T)      -- channels on sublanes, spatial on lanes
    # o_ref : VMEM (C, T)
    x = x_ref[...]                               # keep input dtype for the scale
    C, T = x.shape
    # logits[p] = b + sum_c w[c] * x[c, p]       (f32 accumulate, VPU MACs only)
    logits = jnp.full((1, T), b_ref[0], dtype=jnp.float32)
    for c in range(C):                           # static unroll; C is small
        logits = logits + w_ref[c] * x[c:c + 1, :].astype(jnp.float32)
    attn = jax.nn.sigmoid(logits)                # (1, T) f32, EUP
    o_ref[...] = x * attn.astype(x.dtype)        # broadcast over sublanes (channels)


def spatial_attention(x_nchw, weight, bias, *, target_block_bytes=2 << 20):
    """x_nchw: (B, C, H, W); weight: (1, C, 1, 1); bias: (1,)."""
    B, C, H, W = x_nchw.shape
    HW = H * W
    x3 = x_nchw.reshape(B, C, HW)                # free reshape of NCHW, no transpose

    w = weight.reshape(C).astype(jnp.float32)    # (C,)  -> SMEM
    b = bias.reshape(1).astype(jnp.float32)      # (1,)  -> SMEM

    # Spatial (lane) tile: multiple of 128 lanes, ~target_block_bytes per block,
    # capped at the full spatial extent.  Double-buffered in+out (4x block) stays
    # far under the 16/32 MiB scoped-VMEM defaults of v5e / v6e / v7x.
    itemsize = x3.dtype.itemsize
    max_lanes = max(128, (target_block_bytes // (C * itemsize)) // 128 * 128)
    tile_hw = HW if HW <= max_lanes else max_lanes
    n_hw = pl.cdiv(HW, tile_hw)                  # partial tail block masked by Pallas

    out3 = pl.pallas_call(
        _spatial_attn_kernel,
        out_shape=jax.ShapeDtypeStruct((B, C, HW), x3.dtype),
        grid_spec=pltpu.PrefetchScalarGridSpec(
            num_scalar_prefetch=0,
            grid=(B, n_hw),
            in_specs=[
                pl.BlockSpec(memory_space=pltpu.MemorySpace.SMEM),           # w
                pl.BlockSpec(memory_space=pltpu.MemorySpace.SMEM),           # b
                pl.BlockSpec((None, C, tile_hw), lambda bi, j: (bi, 0, j)),  # x
            ],
            out_specs=pl.BlockSpec((None, C, tile_hw), lambda bi, j: (bi, 0, j)),
        ),
        compiler_params=pltpu.CompilerParams(
            # Both axes independent -> shard the loop across the two TCs on v7x.
            dimension_semantics=("parallel", "parallel"),
            vmem_limit_bytes=32 << 20,
        ),
    )(w, b, x3)

    return out3.reshape(B, C, H, W)


def _reference(x, weight, bias):
    C = x.shape[1]
    logits = jnp.einsum("bchw,c->bhw", x, weight.reshape(C)) + bias[0]
    return x * jax.nn.sigmoid(logits)[:, None, :, :]


if __name__ == "__main__":
    key = jax.random.PRNGKey(0)
    kx, kw, kb = jax.random.split(key, 3)

    # Primary test: module-sized input (B=2, C=4, H=W=16).
    B, C, H, W = 2, 4, 16, 16
    x = jax.random.normal(kx, (B, C, H, W), dtype=jnp.float32)
    weight = jax.random.normal(kw, (1, C, 1, 1), dtype=jnp.float32) * 0.1
    bias = jax.random.normal(kb, (1,), dtype=jnp.float32) * 0.1

    out = jax.block_until_ready(spatial_attention(x, weight, bias))
    ref = _reference(x, weight, bias)
    assert jnp.allclose(out, ref, atol=1e-5, rtol=1e-5), "mismatch vs reference"

    # Secondary test: non-128-multiple spatial extent + forced multi-tile grid
    # with a partial tail block (exercises the ragged / masked path).
    k2x, k2w, k2b = jax.random.split(jax.random.PRNGKey(1), 3)
    B2, C2, H2, W2 = 1, 3, 20, 27                 # HW = 540
    x2 = jax.random.normal(k2x, (B2, C2, H2, W2), dtype=jnp.float32)
    w2 = jax.random.normal(k2w, (1, C2, 1, 1), dtype=jnp.float32) * 0.1
    b2 = jax.random.normal(k2b, (1,), dtype=jnp.float32) * 0.1
    out2 = jax.block_until_ready(
        spatial_attention(x2, w2, b2, target_block_bytes=4096))  # tile_hw=256, 3 tiles
    ref2 = _reference(x2, w2, b2)
    assert jnp.allclose(out2, ref2, atol=1e-5, rtol=1e-5), "mismatch vs reference (tiled)"

    print("KERNEL_OK")
</pallas_src>

<mosaic_0001>
module attributes {stable_mosaic.version = 11 : i64} {
  func.func @_spatial_attn_kernel(%arg0: i32, %arg1: i32, %arg2: memref<4xf32, #tpu.memory_space<smem>>, %arg3: memref<1xf32, #tpu.memory_space<smem>>, %arg4: memref<1x4x256xf32, #tpu.memory_space<vmem>>, %arg5: memref<1x4x256xf32, #tpu.memory_space<vmem>>) attributes {dimension_semantics = [#tpu.dimension_semantics<parallel>, #tpu.dimension_semantics<parallel>], iteration_bounds = array<i64: 2, 1>, scalar_prefetch = 0 : i64, scratch_operands = 0 : i64, tpu.core_type = #tpu.core_type<tc>, window_params = [{transform_indices = @transform_0, window_bounds = array<i64: 4>}, {transform_indices = @transform_1, window_bounds = array<i64: 1>}, {transform_indices = @transform_2, window_bounds = array<i64: 1, 4, 256>}, {transform_indices = @transform_3, window_bounds = array<i64: 1, 4, 256>}]} {
    %c0 = arith.constant 0 : index
    %c0_0 = arith.constant 0 : index
    %c0_1 = arith.constant 0 : index
    %0 = vector.load %arg4[%c0, %c0_0, %c0_1] : memref<1x4x256xf32, #tpu.memory_space<vmem>>, vector<1x4x256xf32>
    %1 = vector.shape_cast %0 : vector<1x4x256xf32> to vector<4x256xf32>
    %c0_2 = arith.constant 0 : index
    %2 = memref.load %arg3[%c0_2] : memref<1xf32, #tpu.memory_space<smem>>
    %3 = vector.broadcast %2 : f32 to vector<1x256xf32>
    %c0_3 = arith.constant 0 : index
    %4 = memref.load %arg2[%c0_3] : memref<4xf32, #tpu.memory_space<smem>>
    %5 = vector.extract_strided_slice %1 {offsets = [0, 0], sizes = [1, 256], strides = [1, 1]} : vector<4x256xf32> to vector<1x256xf32>
    %6 = vector.broadcast %4 : f32 to vector<1x256xf32>
    %7 = arith.mulf %6, %5 : vector<1x256xf32>
    %8 = arith.addf %3, %7 : vector<1x256xf32>
    %c1 = arith.constant 1 : index
    %9 = memref.load %arg2[%c1] : memref<4xf32, #tpu.memory_space<smem>>
    %10 = vector.extract_strided_slice %1 {offsets = [1, 0], sizes = [1, 256], strides = [1, 1]} : vector<4x256xf32> to vector<1x256xf32>
    %11 = vector.broadcast %9 : f32 to vector<1x256xf32>
    %12 = arith.mulf %11, %10 : vector<1x256xf32>
    %13 = arith.addf %8, %12 : vector<1x256xf32>
    %c2 = arith.constant 2 : index
    %14 = memref.load %arg2[%c2] : memref<4xf32, #tpu.memory_space<smem>>
    %15 = vector.extract_strided_slice %1 {offsets = [2, 0], sizes = [1, 256], strides = [1, 1]} : vector<4x256xf32> to vector<1x256xf32>
    %16 = vector.broadcast %14 : f32 to vector<1x256xf32>
    %17 = arith.mulf %16, %15 : vector<1x256xf32>
    %18 = arith.addf %13, %17 : vector<1x256xf32>
    %c3 = arith.constant 3 : index
    %19 = memref.load %arg2[%c3] : memref<4xf32, #tpu.memory_space<smem>>
    %20 = vector.extract_strided_slice %1 {offsets = [3, 0], sizes = [1, 256], strides = [1, 1]} : vector<4x256xf32> to vector<1x256xf32>
    %21 = vector.broadcast %19 : f32 to vector<1x256xf32>
    %22 = arith.mulf %21, %20 : vector<1x256xf32>
    %23 = arith.addf %18, %22 : vector<1x256xf32>
    %24 = arith.negf %23 : vector<1x256xf32>
    %25 = math.exp %24 : vector<1x256xf32>
    %cst = arith.constant 1.000000e+00 : f32
    %26 = vector.broadcast %cst : f32 to vector<1x256xf32>
    %27 = arith.addf %26, %25 : vector<1x256xf32>
    %28 = arith.divf %26, %27 : vector<1x256xf32>
    %29 = vector.broadcast %28 : vector<1x256xf32> to vector<4x256xf32>
    %30 = arith.mulf %1, %29 : vector<4x256xf32>
    %c0_4 = arith.constant 0 : index
    %c0_5 = arith.constant 0 : index
    %c0_6 = arith.constant 0 : index
    %31 = vector.load %arg5[%c0_4, %c0_5, %c0_6] : memref<1x4x256xf32, #tpu.memory_space<vmem>>, vector<1x4x256xf32>
    %32 = vector.shape_cast %31 : vector<1x4x256xf32> to vector<4x256xf32>
    %33 = vector.shape_cast %30 : vector<4x256xf32> to vector<1x4x256xf32>
    tpu.vector_store %arg5[%c0_4, %c0_5, %c0_6], %33 {strides = array<i32>} : memref<1x4x256xf32, #tpu.memory_space<vmem>>, vector<1x4x256xf32>,
    return
  }
  func.func @transform_0(%arg0: i32, %arg1: i32) -> i32 {
    %c0_i32 = arith.constant 0 : i32
    %c0_i32_0 = arith.constant 0 : i32
    return %c0_i32 : i32
  }
  func.func @transform_1(%arg0: i32, %arg1: i32) -> i32 {
    %c0_i32 = arith.constant 0 : i32
    %c0_i32_0 = arith.constant 0 : i32
    return %c0_i32 : i32
  }
  func.func @transform_2(%arg0: i32, %arg1: i32) -> (i32, i32, i32) {
    %c0_i32 = arith.constant 0 : i32
    %c0_i32_0 = arith.constant 0 : i32
    return %arg0, %c0_i32, %arg1 : i32, i32, i32
  }
  func.func @transform_3(%arg0: i32, %arg1: i32) -> (i32, i32, i32) {
    %c0_i32 = arith.constant 0 : i32
    %c0_i32_0 = arith.constant 0 : i32
    return %arg0, %c0_i32, %arg1 : i32, i32, i32
  }
}

</mosaic_0001>

<bundles_post_ra>
// kernel: tpu_custom_call.1
= control target key start
LH: loop header
LB: loop body
LE: loop exit
PB: predicated region body
PF: predicated region fallthrough
CT: control target
= control target key end

     0   :  { %s813_s0 = inlined_call_operand.vmem [shape: f32[4], index: 0, kind: input, shape index: {}]   ;;  %s814_s1 = inlined_call_operand.<no memory space> [shape: f32[1], index: 1, kind: input, shape index: {}]   ;;  %s815_s2 = inlined_call_operand.hbm [shape: f32[2,4,256], index: 2, kind: input, shape index: {}]   ;;  %s816_s3 = inlined_call_operand.hbm [shape: f32[2,4,256], index: 3, kind: output, shape index: {}]  }
   0x1   :  { %8 = sst [smem:[#allocation2]] %s814_s1 }
   0x2   :  { %9 = vsyncpa [#allocation6], 0 }
   0x3   :  { %10 = vsyncpa [#allocation4], 0 }
   0x4   :  { %12 = vsyncpa [#allocation4 + $0x1], 0 }
   0x5   :  { %13 = vsyncpa [#allocation5], 0 }
   0x6   :  { %15 = vsyncpa [#allocation5 + $0x1], 0  ;;  %s664_s14 = smov 0   ;;  %s666_s15 = smov 0  }
   0x7   :  { %s668_s16 = smov 0   ;;  %s670_s17 = smov 0  }
   0x8   :  { %s672_s18 = smov 0   ;;  %s674_s19 = smov 0  }
   0x9 LB: > { %s404_s1 = sadd.s32 4294967295, %s638_s19   ;;  %s405_s20 = sadd.s32 4294967294, %s638_s19   ;;  %s638_s19 = sphi %s674_s19, %s21_s19   ;;  %s634_s18 = sphi %s672_s18, %s828_s18   ;;  %s630_s17 = sphi %s670_s17, %s827_s17   ;;  %s626_s16 = sphi %s668_s16, %s826_s16   ;;  %s622_s15 = sphi %s666_s15, %s825_s15   ;;  %s618_s14 = sphi %s664_s14, %s824_s14  }
   0xa   : > { %p97_p0 = scmp.ne.s32.totalorder %s622_s15, %s618_s14  ;;  %p698_p1 = scmp.eq.s32.totalorder %s404_s1, 0 }
   0xb   : > { %p702_p2 = scmp.eq.s32.totalorder %s404_s1, 1  ;;  %p129_p3 = scmp.eq.s32.totalorder %s405_s20, 1 }
   0xc   : > { %p708_p4 = por %p698_p1, %p97_p0  ;;  %p406_p5 = scmp.ge.s32.totalorder %s638_s19, 1 }
   0xd   : > { %p713_p6 = por %p129_p3, %p97_p0  ;;  %p136_p7 = scmp.lt.s32.totalorder %s638_s19, 3 }
   0xe   : > { %s148_s27 = sshll.u32 %s813_s0, 4  ;;  %s33_s29 = sadd.s32 1, %s634_s18  ;;  %s149_s27 = int_to_ptr.vmem [resolvable:$true] %s148_s27 }
   0xf   : > { %p721_p8 = pnand %p406_p5, %p136_p7  ;;  %s84_s30 = sadd.s32 1, %s626_s16 }
  0x10   : > { %p35_p12 = scmp.ge.s32.totalorder %s33_s29, 2  ;;  %s640_s4 = smov [#allocation3]  }
  0x11   : > { %p438_p10 = pneg %p721_p8  ;;  %p91_p13 = scmp.ne.s32.totalorder %s626_s16, %s622_s15 }
  0x12   : > { %s830_s29 = smov (%p35_p12, %s33_s29), 0  ;;  %p92_p0 = scmp.eq.s32.totalorder %s638_s19, 0 }
  0x13   : > { %p439_p11 = pnand %p438_p10, %p698_p1  ;;  %s79_s5 = ssub.s32 %s634_s18, %s830_s29 }
  0x14   : > { %p451_p3 = scmp.lt.s32.totalorder %s638_s19, 2  ;;  %p82_p5 = scmp.eq.s32.totalorder %s79_s5, 0 }
  0x15   : > { %441 = dma.vmem_to_smem (!%p439_p11), %s149_s27, 16, %s640_s4, [#allocation6]  }
  0x16   : > { %p93_p7 = por %p92_p0, %p91_p13  ;;  %p742_p9 = por %p702_p2, %p91_p13 }
  0x17   : > { %s162_s7 = sand.u32 1, %s626_s16   ;;  %s428_s10 = sshll.u32 %s634_s18, 3 }
  0x18   : > { %s748_s8 = scalar_select %p82_p5, %s626_s16, %s84_s30  }
  0x19   : > { %s409_s9 = sshll.u32 %s162_s7, 3  ;;  %s173_s13 = scalar_lea.hbm %s815_s2, %s428_s10 }
  0x1a   : > { %s166_s1 = scalar_lea.vmem [#allocation7], %s409_s9  ;;  %s175_s25 = sshll.u32 %s173_s13, 4  ;;  %s176_s25 = int_to_ptr.hbm [resolvable:$true] %s175_s25 }
  0x1b   : > { %s177_s20 = sshll.u32 %s166_s1, 4  ;;  %p443_p10 = pnand %p451_p3, %p93_p7  ;;  %s178_s20 = int_to_ptr.vmem [resolvable:$true] %s177_s20 }
  0x1c   : > { %s163_s22 = scalar_lea.sflag [#allocation4], %s162_s7  ;;  %186 = sbr.rel (%p721_p8) target bundleno = 99 (0x63), region = 32 }
  0x1d   : > { %445 = dma.hbm_to_vmem [thread:$0]  (!%p443_p10), %s176_s25, 128, %s178_s20, %s163_s22  }
  0x21   : > { %605 = dma.done.wait (%p698_p1), [#allocation6], 16  }
  0x22   : > { %607 = vsyncadd (%p698_p1), [#allocation6], 4294967280  ;;  %s763_s26 = sand.u32 1, %s622_s15  }
  0x23   : > { %s414_s27 = sshll.u32 %s763_s26, 3  ;;  %s194_s30 = scalar_lea.sflag [#allocation4], %s763_s26 }
  0x24   : > { %s197_s4 = scalar_lea.vmem [#allocation7], %s414_s27 }
  0x25   : > { %609 = dma.done.wait (%p708_p4), %s194_s30, 128  }
  0x26   : > { %611 = vsyncadd (%p708_p4), %s194_s30, 4294967168 }
  0x27   : > { %203 = sfence }
  0x28   : > { %s225_s28 = sld [smem:[#allocation2]]  ;;  %v224_v0 = vld [vmem:[%s197_s4] sm:$0xff]  ;;  %s429_s23 = sshll.u32 %s630_s17, 3  ;;  %vm284_vm4 = vcmask 1043456  }
  0x29   : > { %s227_s21 = sld [smem:[#allocation3]]  ;;  %s303_s12 = scalar_lea.hbm %s816_s3, %s429_s23 }
  0x2a   : > { %s416_s5 = sld [smem:[#allocation3 + $0x1]]  ;;  %s221_s13 = scalar_lea.vmem [#allocation8], %s414_s27 }
  0x2b   : > { %s418_s7 = sld [smem:[#allocation3 + $0x2]]  ;;  %s305_s1 = sshll.u32 %s221_s13, 4  ;;  %s306_s1 = int_to_ptr.vmem [resolvable:$true] %s305_s1 }
  0x2c   : > { %s420_s9 = sld [smem:[#allocation3 + $0x3]]  ;;  %s307_s20 = sshll.u32 %s303_s12, 4  ;;  %s308_s20 = int_to_ptr.hbm [resolvable:$true] %s307_s20 }
  0x2d   : > { %s290_s17 = scalar_lea.sflag [#allocation5], %s763_s26  ;;  %s566_s25 = sshra.s32 %s308_s20, 4  ;;  %s567_s25 = int_to_ptr.hbm [resolvable:$true] %s566_s25 }
  0x2e   : > { %v226_v1 = vstv %s225_s28  ;;  %s568_s22 = scalar_lea.hbm %s567_s25, 8  ;;  %s572_s27 = scalar_lea.hbm %s816_s3, 16 }
  0x2f   : > { %v228_v2 = vstv %s227_s21  ;;  %p569_p1 = scmp.ne.s32.totalorder %s567_s25, %s568_s22  ;;  %p573_p8 = scmp.lt.s32.totalorder %s567_s25, %s816_s3 }
  0x30   : > { %v229_v3 = vmul.f32 %v228_v2, %v224_v0  ;;  %v232_v4 = vstv %s416_s5  ;;  %p574_p11 = scmp.lt.s32.totalorder %s572_s27, %s568_s22 }
  0x31   : > { %v233_v5 = vmul.f32 %v232_v4, %v224_v0  ;;  %v240_v6 = vstv %s418_s7  ;;  %p570_p2 = pnand %p569_p1, %p742_p9 }
  0x32   : > { %v230_v7 = vadd.f32 %v229_v3, %v226_v1  ;;  %v241_v8 = vmul.f32 %v240_v6, %v224_v0  ;;  %v248_v9 = vstv %s420_s9  ;;  %p575_p12 = por %p574_p11, %p573_p8 }
  0x33   : > { %v417_v10 = vrot.slane %v233_v5, 9  ;;  %v249_v11 = vmul.f32 %v248_v9, %v224_v0  ;;  %p571_p4 = pneg %p570_p2 }
  0x34   : > { %v419_v12 = vrot.slane %v241_v8, 10 }
  0x35   : > { %v238_v13 = vadd.f32 %v417_v10, %v230_v7  ;;  %v421_v14 = vrot.slane %v249_v11, 11  ;;  %p576_p13 = pnand %p575_p12, %p571_p4 }
  0x37   : > { %v246_v15 = vadd.f32 %v419_v12, %v238_v13 }
  0x39   : > { %v254_v16 = vadd.f32 %v421_v14, %v246_v15 }
  0x3b   : > { %v422_v17 = vmul.f32 -1.442695, %v254_v16 }
  0x3d   : > { %503 = vpow2.f32 %v422_v17 }
  0x43   : > { %v504_v18 = vpop.eup %503 }
  0x44   : > { %v258_v19 = vadd.f32 1.0, %v504_v18 }
  0x46   : > { %505 = vrcp.f32 %v258_v19  ;;  %v270_v22 = vand.u32 2147483648, %v258_v19  ;;  %vm264_vm0 = vweird.f32 %v258_v19  ;;  %v268_v24 = vand.u32 2147483647, %v258_v19 }
  0x48   : > { %v271_v26 = vor.u32 1.1754944e-38, %v270_v22  ;;  %vm269_vm3 = vcmp.eq.f32.partialorder %v268_v24, 8.507059e+37 }
  0x4c   : > { %v506_v20 = vpop.eup %505 }
  0x4d   : > { %v260_v21 = vmul.f32 %v506_v20, %v258_v19  ;;  %vm265_vm1 = vweird.f32 %v506_v20 }
  0x4e   : > { %vm266_vm2 = vmor %vm264_vm0, %vm265_vm1 }
  0x4f   : > { %v261_v23 = vsub.f32 1.0, %v260_v21 }
  0x51   : > { %v262_v25 = vmul.f32 %v506_v20, %v261_v23 }
  0x53   : > { %v263_v27 = vadd.f32 %v506_v20, %v262_v25 }
  0x55   : > { %v267_v28 = vsel %vm266_vm2, %v506_v20, %v263_v27 }
  0x56   : > { %v272_v29 = vsel %vm269_vm3, %v271_v26, %v267_v28 }
  0x57   : > { %v275_v30 = vperm.slane %v272_v29, 0  ;;  %v276_v31 = vperm.slane %v272_v29, 4 }
  0x59   : > { %v279_v32 = vperm.slane %v275_v30, 0  ;;  %v280_v33 = vperm.slane %v276_v31, 0 }
  0x5b   : > { %v283_v34 = vrot.slane %v280_v33, 4 }
  0x5d   : > { %v285_v35 = vsel %vm284_vm4, %v279_v32, %v283_v34 }
  0x5e   : > { %v287_v36 = vmul.f32 %v285_v35, %v224_v0 }
  0x60   : > { %288 = vst [vmem:[%s221_s13] sm:$0xff] %v287_v36 }
  0x61   : > { %579 = shalt.err (!%p576_p13)
}
  0x62   : > { %436 = dma.vmem_to_hbm [thread:$0]  (%p742_p9), %s306_s1, 128, %s308_s20, %s290_s17  }
  0x63 PF: > { %s319_s26 = sand.u32 1, %s618_s14   ;;  %p823_p0 = scmp.ge.s32.totalorder %s638_s19, 2 }
  0x64   : > { %s320_s5 = scalar_lea.sflag [#allocation5], %s319_s26 }
  0x65   : > { %p447_p3 = pnand %p823_p0, %p713_p6 }
  0x67   : > { %p448_p5 = pneg %p447_p3 }
  0x69   : > { %613 = dma.done.wait (%p448_p5), %s320_s5, 128  }
  0x6a   : > { %615 = vsyncadd (%p448_p5), %s320_s5, 4294967168  ;;  %s21_s19 = sadd.s32 1, %s638_s19   ;;  %s824_s14 = smov %s622_s15 }
  0x6b   : > { %p18_p7 = scmp.ge.s32.totalorder %s21_s19, 4   ;;  %s825_s15 = smov %s626_s16 }
  0x6c   : > { %s826_s16 = smov %s748_s8  ;;  %s827_s17 = smov %s634_s18 }
  0x6d   : > { %s828_s18 = smov %s830_s29  ;;  %20 = sbr.rel (!%p18_p7) target bundleno = 9 (0x9), region = 82 }
  0x72   :  { %326 = vsyncpa [#allocation4], 1 }
  0x73   :  { %328 = vsyncpa [#allocation4 + $0x1], 1 }
  0x74   :  { %329 = vsyncpa [#allocation5], 1 }
  0x75   :  { %331 = vsyncpa [#allocation5 + $0x1], 1 }
  0x76   :  { %332 = vsyncpa [#allocation6], 1 }
  0x77   :  { %334 = vsyncpa [#allocation6 + $0x1], 1 }

</bundles_post_ra>
